<compile_context>
chip_gen: v6e
topology: v6e:2x2x1
jax: 0.10.0
libtpu: 0.0.40
codegen_flags: <defaults>
</compile_context>

<pallas_src>
import functools

import jax
import jax.numpy as jnp
from jax.experimental import pallas as pl
from jax.experimental.pallas import tpu as pltpu

SIGMA_DATA = 0.5
_HIGHEST = jax.lax.Precision.HIGHEST   # exact-f32 matmuls on the XLA side


# ----------------------------- Pallas kernel ---------------------------------
def edm_precond_kernel(coef_ref,     # SMEM (3, B): c_in, c_skip, c_out per batch
                       x_ref,        # VMEM (bb, C_total, HW)  noisy + condition channels
                       w1t_ref,      # VMEM (hidden, C_total)  merged W1^T   (resident)
                       w2t_ref,      # VMEM (Cgen, hidden)     W2^T          (resident)
                       emb_ref,      # VMEM (B, hidden, 1)     emb + b1      (resident)
                       b2t_ref,      # VMEM (Cgen, 1)          b2^T          (resident)
                       out_ref,      # VMEM (bb, Cgen, HW)
                       *, cgen, bb):
    step = pl.program_id(0)
    _, c_total, hw = x_ref.shape

    # Hoisted once per grid step: resident weights and the generation-channel mask.
    w1t = w1t_ref[...]
    w2t = w2t_ref[...]
    b2 = b2t_ref[...]
    gen_mask = jax.lax.broadcasted_iota(jnp.int32, (c_total, hw), 0) < cgen

    for lb in range(bb):                                  # static unroll (bb is small)
        b = step * bb + lb                                # global batch index
        c_in = coef_ref[0, b]
        c_skip = coef_ref[1, b]
        c_out = coef_ref[2, b]

        xb = x_ref[lb]                                    # (C_total, HW)

        # Merged first layer: W1^T @ [c_in * x_gen ; x_cond]
        #   == W1_full^T @ (per-channel scale * x)  -- one K=C_total matmul,
        # no sublane-offset slice of the condition channels.
        x_s = jnp.where(gen_mask, c_in * xb, xb)          # one VPU mul+select
        h = (jnp.dot(w1t, x_s, preferred_element_type=jnp.float32)
             + emb_ref[b])                                # (hidden, HW), emb+b1 lane-broadcast
        h = h * jax.nn.sigmoid(h)                         # SiLU (VPU + EUP)
        f = (jnp.dot(w2t, h, preferred_element_type=jnp.float32)
             + b2)                                        # (Cgen, HW)

        # D_x = c_skip * x_noisy + c_out * F_x  -> lane-dense (Cgen, HW) store
        out_ref[lb] = c_skip * xb[:cgen, :] + c_out * f


# ------------------------------- wrapper --------------------------------------
def _batches_per_step(batch):
    # Two balanced grid steps when possible (keeps both v7x TensorCores busy);
    # one fat step otherwise.  On v5e/v6e the extra step is ~0.35us: negligible.
    if batch % 2 == 0 and batch >= 2:
        return batch // 2
    return batch


def edm_precond(x, sigma, params, generation_channels):
    """x: NCHW [B, C_total, H, W] float32, sigma: [B] float32 -> [B, Cgen, H, W]."""
    w1a, w1b, b1, wt1, bt1, wt2, w2, b2 = params
    B, C_total, H, W = x.shape
    Cgen = generation_channels
    HW = H * W
    hidden = w1a.shape[1]
    bb = _batches_per_step(B)

    x = x.astype(jnp.float32)
    sigma = sigma.astype(jnp.float32).reshape(B)

    # Per-batch preconditioning coefficients (scalar path -> SMEM via prefetch).
    sig2 = sigma * sigma
    c_skip = SIGMA_DATA ** 2 / (sig2 + SIGMA_DATA ** 2)
    c_out = sigma * SIGMA_DATA / jnp.sqrt(sig2 + SIGMA_DATA ** 2)
    c_in = 1.0 / jnp.sqrt(SIGMA_DATA ** 2 + sig2)
    c_noise = jnp.log(sigma) / 4.0
    coef = jnp.stack([c_in, c_skip, c_out], axis=0)                    # (3, B)

    # Noise-embedding MLP hoisted out of the kernel (its matmul has M=1 and the
    # result is a per-batch constant).  b1 folded in.  Shaped (B, hidden, 1) so
    # inside the kernel it is a per-hidden-row bias in the [C, HW] layout.
    e = c_noise[:, None] * wt1 + bt1                                   # (B, EMB)
    e = e * jax.nn.sigmoid(e)                                          # SiLU
    emb = (jnp.matmul(e, wt2, precision=_HIGHEST) + b1)[:, :, None]    # (B, hidden, 1)

    # Merged + transposed weights for the channels-on-sublanes layout.
    w1t = jnp.concatenate([w1a, w1b], axis=0).T                        # (hidden, C_total)
    w2t = w2.T                                                         # (Cgen, hidden)
    b2t = b2.T                                                         # (Cgen, 1)

    # NCHW is already channels-major: pure reshape, no transpose / HBM pass.
    x3 = x.reshape(B, C_total, HW)

    kernel = functools.partial(edm_precond_kernel, cgen=Cgen, bb=bb)
    const2 = lambda i, coef: (0, 0)
    const3 = lambda i, coef: (0, 0, 0)

    out = pl.pallas_call(
        kernel,
        out_shape=jax.ShapeDtypeStruct((B, Cgen, HW), jnp.float32),
        grid_spec=pltpu.PrefetchScalarGridSpec(
            num_scalar_prefetch=1,                                     # coef -> SMEM
            grid=(B // bb,),
            in_specs=[
                pl.BlockSpec((bb, C_total, HW), lambda i, coef: (i, 0, 0)),  # x
                pl.BlockSpec((hidden, C_total), const2),                     # W1^T   (resident)
                pl.BlockSpec((Cgen, hidden), const2),                        # W2^T   (resident)
                pl.BlockSpec((B, hidden, 1), const3),                        # emb+b1 (resident)
                pl.BlockSpec((Cgen, 1), const2),                             # b2^T   (resident)
            ],
            out_specs=pl.BlockSpec((bb, Cgen, HW), lambda i, coef: (i, 0, 0)),
        ),
        compiler_params=pltpu.CompilerParams(dimension_semantics=("parallel",)),
    )(coef, x3, w1t, w2t, emb, b2t)

    # back to NCHW like the PyTorch module (pure reshape, no transpose)
    return out.reshape(B, Cgen, H, W)


# --------------------------- pure-JAX reference --------------------------------
def _inner_model_ref(x_nchw, c_noise, params, Cgen):
    w1a, w1b, b1, wt1, bt1, wt2, w2, b2 = params
    B, C, H, W = x_nchw.shape
    x_cl = x_nchw.transpose(0, 2, 3, 1).reshape(B, H * W, C)
    w1 = jnp.concatenate([w1a, w1b], axis=0)
    e = jax.nn.silu(c_noise[:, None] * wt1 + bt1)                      # (B, EMB)
    emb = jnp.matmul(e, wt2, precision=_HIGHEST)                       # (B, hidden)
    h = jax.nn.silu(jnp.matmul(x_cl, w1, precision=_HIGHEST) + b1 + emb[:, None, :])
    F = jnp.matmul(h, w2, precision=_HIGHEST) + b2                     # (B, HW, Cgen)
    return F.reshape(B, H, W, Cgen).transpose(0, 3, 1, 2)


def edm_precond_ref(x, sigma, params, Cgen):
    # Mirrors the PyTorch forward (float32 path; fp16 only triggers on CUDA).
    x = x.astype(jnp.float32)
    sigma = sigma.astype(jnp.float32).reshape(-1, 1, 1, 1)
    c_skip = SIGMA_DATA ** 2 / (sigma ** 2 + SIGMA_DATA ** 2)
    c_out = sigma * SIGMA_DATA / jnp.sqrt(sigma ** 2 + SIGMA_DATA ** 2)
    c_in = 1.0 / jnp.sqrt(SIGMA_DATA ** 2 + sigma ** 2)
    c_noise = jnp.log(sigma) / 4.0
    x_noisy = x[:, :Cgen]
    x_cond = x[:, Cgen:]
    model_in = jnp.concatenate([x_noisy * c_in, x_cond], axis=1)
    F_x = _inner_model_ref(model_in, c_noise.reshape(-1), params, Cgen)
    return c_skip * x_noisy + c_out * F_x


# ---------------------------------- main ---------------------------------------
if __name__ == "__main__":
    B, Cgen, Ccond, H, W = 2, 4, 4, 16, 16
    HIDDEN, EMB = 32, 16
    C_total = Cgen + Ccond

    key = jax.random.PRNGKey(0)
    ks = jax.random.split(key, 10)
    x = jax.random.normal(ks[0], (B, C_total, H, W), dtype=jnp.float32)
    sigma = jax.random.uniform(ks[1], (B,), minval=0.05, maxval=5.0, dtype=jnp.float32)

    # deterministic synthetic inner-model parameters
    # TODO(synk): the real inner diffusion UNet is passed in at __init__ and is not
    # part of this module; a small synthetic 1x1-conv + noise-embedding model is used.
    params = (
        0.2 * jax.random.normal(ks[2], (Cgen, HIDDEN), dtype=jnp.float32),   # w1a
        0.2 * jax.random.normal(ks[3], (Ccond, HIDDEN), dtype=jnp.float32),  # w1b
        0.1 * jax.random.normal(ks[4], (1, HIDDEN), dtype=jnp.float32),      # b1
        0.2 * jax.random.normal(ks[5], (1, EMB), dtype=jnp.float32),         # wt1
        0.1 * jax.random.normal(ks[6], (1, EMB), dtype=jnp.float32),         # bt1
        0.2 * jax.random.normal(ks[7], (EMB, HIDDEN), dtype=jnp.float32),    # wt2
        0.2 * jax.random.normal(ks[8], (HIDDEN, Cgen), dtype=jnp.float32),   # w2
        0.1 * jax.random.normal(ks[9], (1, Cgen), dtype=jnp.float32),        # b2
    )

    run = jax.jit(functools.partial(edm_precond, generation_channels=Cgen))
    d_x = run(x, sigma, params)
    d_x = jax.block_until_ready(d_x)

    d_ref = edm_precond_ref(x, sigma, params, Cgen)
    assert d_x.shape == (B, Cgen, H, W), d_x.shape
    assert d_x.dtype == jnp.float32
    err = float(jnp.max(jnp.abs(d_x - d_ref)))
    assert jnp.allclose(d_x, d_ref, rtol=1e-4, atol=1e-4), err

    print("KERNEL_OK")
</pallas_src>

<mosaic_0001>
module attributes {stable_mosaic.version = 11 : i64} {
  func.func @edm_precond_kernel(%arg0: i32, %arg1: memref<3x2xf32, #tpu.memory_space<smem>>, %arg2: memref<1x8x256xf32, #tpu.memory_space<vmem>>, %arg3: memref<32x8xf32, #tpu.memory_space<vmem>>, %arg4: memref<4x32xf32, #tpu.memory_space<vmem>>, %arg5: memref<2x32x1xf32, #tpu.memory_space<vmem>>, %arg6: memref<4x1xf32, #tpu.memory_space<vmem>>, %arg7: memref<1x4x256xf32, #tpu.memory_space<vmem>>) attributes {dimension_semantics = [#tpu.dimension_semantics<parallel>], iteration_bounds = array<i64: 2>, scalar_prefetch = 1 : i64, scratch_operands = 0 : i64, tpu.core_type = #tpu.core_type<tc>, window_params = [{transform_indices = @transform_0, window_bounds = array<i64: 1, 8, 256>}, {pipeline_mode = #tpu.pipeline_mode<synchronous>, transform_indices = @transform_1, window_bounds = array<i64: 32, 8>}, {pipeline_mode = #tpu.pipeline_mode<synchronous>, transform_indices = @transform_2, window_bounds = array<i64: 4, 32>}, {pipeline_mode = #tpu.pipeline_mode<synchronous>, transform_indices = @transform_3, window_bounds = array<i64: 2, 32, 1>}, {pipeline_mode = #tpu.pipeline_mode<synchronous>, transform_indices = @transform_4, window_bounds = array<i64: 4, 1>}, {transform_indices = @transform_5, window_bounds = array<i64: 1, 4, 256>}]} {
    %c0 = arith.constant 0 : index
    %c0_0 = arith.constant 0 : index
    %0 = vector.load %arg3[%c0, %c0_0] : memref<32x8xf32, #tpu.memory_space<vmem>>, vector<32x8xf32>
    %c0_1 = arith.constant 0 : index
    %c0_2 = arith.constant 0 : index
    %1 = vector.load %arg4[%c0_1, %c0_2] : memref<4x32xf32, #tpu.memory_space<vmem>>, vector<4x32xf32>
    %c0_3 = arith.constant 0 : index
    %c0_4 = arith.constant 0 : index
    %2 = vector.load %arg6[%c0_3, %c0_4] : memref<4x1xf32, #tpu.memory_space<vmem>>, vector<4x1xf32>
    %3 = tpu.iota {dimensions = array<i32: 0>} : vector<8x256xi32>
    %c4_i32 = arith.constant 4 : i32
    %4 = vector.broadcast %c4_i32 : i32 to vector<8x256xi32>
    %5 = arith.cmpi slt, %3, %4 : vector<8x256xi32>
    %c1_i32 = arith.constant 1 : i32
    %6 = arith.muli %arg0, %c1_i32 : i32
    %c0_i32 = arith.constant 0 : i32
    %7 = arith.addi %6, %c0_i32 : i32
    %c0_5 = arith.constant 0 : index
    %8 = arith.index_cast %7 : i32 to index
    %9 = memref.load %arg1[%c0_5, %8] : memref<3x2xf32, #tpu.memory_space<smem>>
    %c1 = arith.constant 1 : index
    %10 = arith.index_cast %7 : i32 to index
    %11 = memref.load %arg1[%c1, %10] : memref<3x2xf32, #tpu.memory_space<smem>>
    %c2 = arith.constant 2 : index
    %12 = arith.index_cast %7 : i32 to index
    %13 = memref.load %arg1[%c2, %12] : memref<3x2xf32, #tpu.memory_space<smem>>
    %c0_6 = arith.constant 0 : index
    %c0_7 = arith.constant 0 : index
    %c0_8 = arith.constant 0 : index
    %14 = vector.load %arg2[%c0_6, %c0_7, %c0_8] : memref<1x8x256xf32, #tpu.memory_space<vmem>>, vector<1x8x256xf32>
    %15 = vector.shape_cast %14 : vector<1x8x256xf32> to vector<8x256xf32>
    %16 = vector.broadcast %9 : f32 to vector<8x256xf32>
    %17 = arith.mulf %16, %15 : vector<8x256xf32>
    %18 = arith.select %5, %17, %15 : vector<8x256xi1>, vector<8x256xf32>
    %cst = arith.constant dense<0.000000e+00> : vector<32x256xf32>
    %19 = tpu.matmul %0, %18, %cst {dimension_numbers = #tpu.dot_dimension_numbers<[1], [0], [0], [1], [0, 0, 1, 1], [], []>} : vector<32x8xf32>, vector<8x256xf32>, vector<32x256xf32> -> vector<32x256xf32>
    %20 = arith.index_cast %7 : i32 to index
    %c0_9 = arith.constant 0 : index
    %c0_10 = arith.constant 0 : index
    %21 = vector.load %arg5[%20, %c0_9, %c0_10] : memref<2x32x1xf32, #tpu.memory_space<vmem>>, vector<1x32x1xf32>
    %22 = vector.shape_cast %21 : vector<1x32x1xf32> to vector<32x1xf32>
    %23 = vector.broadcast %22 : vector<32x1xf32> to vector<32x256xf32>
    %24 = arith.addf %19, %23 : vector<32x256xf32>
    %25 = arith.negf %24 : vector<32x256xf32>
    %26 = math.exp %25 : vector<32x256xf32>
    %cst_11 = arith.constant 1.000000e+00 : f32
    %27 = vector.broadcast %cst_11 : f32 to vector<32x256xf32>
    %28 = arith.addf %27, %26 : vector<32x256xf32>
    %29 = arith.divf %27, %28 : vector<32x256xf32>
    %30 = arith.mulf %24, %29 : vector<32x256xf32>
    %cst_12 = arith.constant dense<0.000000e+00> : vector<4x256xf32>
    %31 = tpu.matmul %1, %30, %cst_12 {dimension_numbers = #tpu.dot_dimension_numbers<[1], [0], [0], [1], [0, 0, 1, 1], [], []>} : vector<4x32xf32>, vector<32x256xf32>, vector<4x256xf32> -> vector<4x256xf32>
    %32 = vector.broadcast %2 : vector<4x1xf32> to vector<4x256xf32>
    %33 = arith.addf %31, %32 : vector<4x256xf32>
    %34 = vector.extract_strided_slice %15 {offsets = [0, 0], sizes = [4, 256], strides = [1, 1]} : vector<8x256xf32> to vector<4x256xf32>
    %35 = vector.broadcast %11 : f32 to vector<4x256xf32>
    %36 = arith.mulf %35, %34 : vector<4x256xf32>
    %37 = vector.broadcast %13 : f32 to vector<4x256xf32>
    %38 = arith.mulf %37, %33 : vector<4x256xf32>
    %39 = arith.addf %36, %38 : vector<4x256xf32>
    %c0_13 = arith.constant 0 : index
    %c0_14 = arith.constant 0 : index
    %c0_15 = arith.constant 0 : index
    %40 = vector.load %arg7[%c0_13, %c0_14, %c0_15] : memref<1x4x256xf32, #tpu.memory_space<vmem>>, vector<1x4x256xf32>
    %41 = vector.shape_cast %40 : vector<1x4x256xf32> to vector<4x256xf32>
    %42 = vector.shape_cast %39 : vector<4x256xf32> to vector<1x4x256xf32>
    tpu.vector_store %arg7[%c0_13, %c0_14, %c0_15], %42 {strides = array<i32>} : memref<1x4x256xf32, #tpu.memory_space<vmem>>, vector<1x4x256xf32>,
    return
  }
  func.func @transform_0(%arg0: i32, %arg1: memref<3x2xf32, #tpu.memory_space<smem>>) -> (i32, i32, i32) {
    %c0_i32 = arith.constant 0 : i32
    %c0_i32_0 = arith.constant 0 : i32
    %c0_i32_1 = arith.constant 0 : i32
    return %arg0, %c0_i32, %c0_i32_0 : i32, i32, i32
  }
  func.func @transform_1(%arg0: i32, %arg1: memref<3x2xf32, #tpu.memory_space<smem>>) -> (i32, i32) {
    %c0_i32 = arith.constant 0 : i32
    %c0_i32_0 = arith.constant 0 : i32
    %c0_i32_1 = arith.constant 0 : i32
    return %c0_i32, %c0_i32_0 : i32, i32
  }
  func.func @transform_2(%arg0: i32, %arg1: memref<3x2xf32, #tpu.memory_space<smem>>) -> (i32, i32) {
    %c0_i32 = arith.constant 0 : i32
    %c0_i32_0 = arith.constant 0 : i32
    %c0_i32_1 = arith.constant 0 : i32
    return %c0_i32, %c0_i32_0 : i32, i32
  }
  func.func @transform_3(%arg0: i32, %arg1: memref<3x2xf32, #tpu.memory_space<smem>>) -> (i32, i32, i32) {
    %c0_i32 = arith.constant 0 : i32
    %c0_i32_0 = arith.constant 0 : i32
    %c0_i32_1 = arith.constant 0 : i32
    %c0_i32_2 = arith.constant 0 : i32
    return %c0_i32, %c0_i32_0, %c0_i32_1 : i32, i32, i32
  }
  func.func @transform_4(%arg0: i32, %arg1: memref<3x2xf32, #tpu.memory_space<smem>>) -> (i32, i32) {
    %c0_i32 = arith.constant 0 : i32
    %c0_i32_0 = arith.constant 0 : i32
    %c0_i32_1 = arith.constant 0 : i32
    return %c0_i32, %c0_i32_0 : i32, i32
  }
  func.func @transform_5(%arg0: i32, %arg1: memref<3x2xf32, #tpu.memory_space<smem>>) -> (i32, i32, i32) {
    %c0_i32 = arith.constant 0 : i32
    %c0_i32_0 = arith.constant 0 : i32
    %c0_i32_1 = arith.constant 0 : i32
    return %arg0, %c0_i32, %c0_i32_0 : i32, i32, i32
  }
}

</mosaic_0001>

<bundles_post_ra>
// kernel: edm_precond.1
= control target key start
LH: loop header
LB: loop body
LE: loop exit
PB: predicated region body
PF: predicated region fallthrough
CT: control target
= control target key end

     0   :  { %s816_s0 = inlined_call_operand.vmem [shape: f32[3,2], index: 0, kind: input, shape index: {}]   ;;  %s817_s1 = inlined_call_operand.vmem [shape: f32[2,8,256], index: 1, kind: input, shape index: {}]   ;;  %s818_s2 = inlined_call_operand.vmem [shape: f32[32,8], index: 2, kind: input, shape index: {}]   ;;  %s819_s3 = inlined_call_operand.vmem [shape: f32[4,32], index: 3, kind: input, shape index: {}]   ;;  %s820_s4 = inlined_call_operand.vmem [shape: f32[2,32,1], index: 4, kind: input, shape index: {}]   ;;  %s821_s5 = inlined_call_operand.vmem [shape: f32[4,1], index: 5, kind: input, shape index: {}]   ;;  %s822_s6 = inlined_call_operand.vmem [shape: f32[2,4,256], index: 6, kind: output, shape index: {}]  }
   0x1   :  { %s11_s23 = sshll.u32 %s816_s0, 4  ;;  %s12_s23 = int_to_ptr.vmem [resolvable:$true] %s11_s23 }
   0x2   :  { %s673_s24 = scalar_lea.vmem %s12_s23, 64  ;;  %p678_p1 = scmp.lt.s32.totalorder %s12_s23, %s12_s23 }
   0x3   :  { %p674_p0 = scmp.ne.s32.totalorder %s12_s23, %s673_s24  ;;  %p679_p2 = scmp.lt.s32.totalorder %s673_s24, %s673_s24 }
   0x5   :  { %p680_p3 = por %p679_p2, %p678_p1 }
   0x7   :  { %p681_p4 = pnand %p680_p3, %p674_p0 }
   0x9   :  { %684 = shalt.err (!%p681_p4)  }
   0xa   :  { %s695_s25 = smov [#allocation3]  }
   0xb   :  { %14 = dma.vmem_to_smem %s12_s23, 64, %s695_s25, [#allocation2] }
   0xc   :  { %689 = dma.done.wait [#allocation2], 64 }
   0xd   :  { %690 = vsyncadd [#allocation2], 4294967232 }
   0xe   :  { %16 = sfence }
   0xf   :  { %s736_s26 = smov 0  }
  0x10 LB: > { %s742_s0 = sadd.s32 4294967295, %s693_s26   ;;  %p599_p5 = scmp.ge.s32.totalorder %s693_s26, 1  ;;  %s693_s26 = sphi %s736_s26, %s22_s26  }
  0x11   : > { %p194_p6 = scmp.lt.s32.totalorder %s693_s26, 3 }
  0x13   : > { %p195_p7 = pnand %p599_p5, %p194_p6 }
  0x14   : > { %p222_p8 = scmp.lt.s32.totalorder (!%p195_p7), %s742_s0, 1  ;;  %s241_s27 = sld [smem:[#allocation3 + %s742_s0]] (!%p195_p7) }
  0x15   : > { %198 = sbr.rel (%p195_p7) target bundleno = 491 (0x1eb), region = 40  ;;  %s606_s29 = sshll.u32 (!%p195_p7), %s742_s0, 5 }
  0x16   : > { %s262_s12 = scalar_lea.vmem (!%p195_p7), %s820_s4, %s606_s29  ;;  %s242_s25 = sshra.s32 (!%p195_p7), %s742_s0, 7 }
  0x1a   : > { %v238_v0 = vlaneseq  ;;  %v696_v1 = vmov 0.0   ;;  %s749_s28 = scalar_select %p222_p8, %s742_s0, 1  ;;  %v697_v3 = vmov 0   ;;  %v256_v5 = vstv %s241_s27  ;;  %v264_v9 = vld [vmem:[%s262_s12 + $0x8] sm:$0xff]  ;;  %v266_v10 = vld [vmem:[%s262_s12 + $0x18] sm:$0xff]  ;;  %v232_v13 = vld [vmem:[%s818_s2] sm:$0xff] }
  0x1b   : > { %364 = vmatprep.mubr.f32.mxu0 %v696_v1  ;;  %518 = vmatprep.mubr.f32.mxu1 %v696_v1  ;;  %vm287_vm1 = vcmask 64512   ;;  %v263_v14 = vld [vmem:[%s262_s12] sm:$0xff]  ;;  %v265_v15 = vld [vmem:[%s262_s12 + $0x10] sm:$0xff]  ;;  %v233_v16 = vld [vmem:[%s818_s2 + $0x8] sm:$0xff]  ;;  %vm450_vm2 = vcmask 261120   ;;  %s624_s27 = sshll.u32 %s242_s25, 7 }
  0x1c   : > { %v239_v2 = vshrl.u32 %v238_v0, 7  ;;  %640 = vset.pattern.permute.xlu1 %v697_v3  ;;  %639 = vset.pattern.permute.xlu0 %v697_v3  ;;  %s622_s30 = sshll.u32 %s749_s28, 4  ;;  %v237_v17 = vld [vmem:[%s821_s5] sm:$0xf]  ;;  %v234_v18 = vld [vmem:[%s818_s2 + $0x10] sm:$0xff]  ;;  %v235_v19 = vld [vmem:[%s818_s2 + $0x18] sm:$0xff] }
  0x1d   : > { %s226_s9 = scalar_lea.vmem %s817_s1, %s622_s30  ;;  %274 = vperm.xlu1 %640, %v264_v9   ;;  %284 = vperm.xlu0 %639, %v266_v10   ;;  %s625_s29 = sadd.s32 128, %s624_s27 }
  0x1e   : > { %vm240_vm0 = vcmp.lt.s32.totalorder %v239_v2, 4  ;;  %v756_v4 = vld [vmem:[%s226_s9 + $0x8] sm:$0xff]  ;;  %v758_v6 = vld [vmem:[%s226_s9] sm:$0xff]  ;;  %s247_s30 = sand.u32 127, %s742_s0  ;;  %s627_s7 = sadd.s32 256, %s624_s27 }
  0x1f   : > { %v258_v7 = vmul.f32 %v256_v5, %v756_v4  ;;  %v257_v8 = vmul.f32 %v256_v5, %v758_v6  ;;  %s248_s8 = sadd.s32 %s625_s29, %s247_s30  ;;  %s252_s9 = sadd.s32 %s627_s7, %s247_s30 }
  0x20   : > { %s249_s10 = sld [smem:[#allocation3 + %s248_s8]]  ;;  %s623_s12 = sshll.u32 %s749_s28, 3 }
  0x21   : > { %v260_v11 = vsel %vm240_vm0, %v258_v7, %v756_v4  ;;  %v259_v12 = vsel %vm240_vm0, %v257_v8, %v758_v6  ;;  %269 = vperm.xlu1 %640, %v263_v14   ;;  %279 = vperm.xlu0 %639, %v265_v15   ;;  %s253_s11 = sld [smem:[#allocation3 + %s252_s9]]  ;;  %s231_s14 = scalar_lea.vmem %s822_s6, %s623_s12 }
  0x22   : > { %330 = vmatprep.subr.mxu0 %v260_v11 }
  0x23   : > { %331 = vmatpush1.msra.mxu0 %v259_v12 }
  0x24   : > { %607 = vmatmul.mubr.msk.f32.vlgmr.msra.gmra.mxu0 %vm287_vm1, %v232_v13 }
  0x25   : > { %370 = vmatprep.mubr.f32.mxu0 %v696_v1  ;;  %447 = vperm.xlu0 %639, %v237_v17  }
  0x28   : > { %608 = vmatmul.mubr.msk.f32.gmra.mxu0 %vm287_vm1, %v233_v16 }
  0x29   : > { %376 = vmatprep.mubr.f32.mxu0 %v696_v1 }
  0x2c   : > { %609 = vmatmul.mubr.msk.f32.gmra.mxu0 %vm287_vm1, %v234_v18  ;;  %v236_v18 = vld [vmem:[%s819_s3] sm:$0xf] }
  0x2d   : > { %382 = vmatprep.mubr.f32.mxu0 %v696_v1 }
  0x30   : > { %610 = vmatmul.mubr.msk.f32.gmra.mxu0 %vm287_vm1, %v235_v19  ;;  %v525_v19 = vstv %s249_s10 }
  0x98   : > { %v275_v20 = vpop.permute.xlu1 %274  ;;  %v285_v22 = vpop.permute.xlu0 %284 }
  0x9c   : > { %v270_v24 = vpop.permute.xlu1 %269  ;;  %v280_v28 = vpop.permute.xlu0 %279 }
  0xe4   : > { %v366_v21 = vpop.f32.mrf.mxu0 }
  0xe5   : > { %v794_v37 = vadd.f32 %v366_v21, %v270_v24 }
  0xe6   : > { %v368_v23 = vpop.f32.mrf.mxu0 }
  0xe7   : > { %v786_v26 = vadd.f32 %v368_v23, %v270_v24  ;;  %v611_v46 = vmul.f32 -1.442695, %v794_v37 }
  0xe8   : > { %v372_v25 = vpop.f32.mrf.mxu0 }
  0xe9   : > { %v612_v31 = vmul.f32 -1.442695, %v786_v26  ;;  %v791_v33 = vadd.f32 %v372_v25, %v275_v20  ;;  %v527_v25 = vmul.f32 %v525_v19, %v756_v4 }
  0xea   : > { %v374_v27 = vpop.f32.mrf.mxu0 }
  0xeb   : > { %v788_v29 = vadd.f32 %v374_v27, %v275_v20  ;;  %641 = vpow2.f32 %v612_v31  ;;  %v613_v42 = vmul.f32 -1.442695, %v791_v33  ;;  %v448_v20 = vpop.permute.xlu0 %447 }
  0xec   : > { %v378_v30 = vpop.f32.mrf.mxu0 }
  0xed   : > { %v379_v32 = vadd.f32 %v378_v30, %v280_v28  ;;  %v614_v34 = vmul.f32 -1.442695, %v788_v29 }
  0xee   : > { %v380_v35 = vpop.f32.mrf.mxu0 }
  0xef   : > { %v381_v36 = vadd.f32 %v380_v35, %v280_v28  ;;  %v615_v38 = vmul.f32 -1.442695, %v379_v32  ;;  %643 = vpow2.f32 %v614_v34 }
  0xf0   : > { %v384_v39 = vpop.f32.mrf.mxu0 }
  0xf1   : > { %v616_v40 = vmul.f32 -1.442695, %v381_v36  ;;  %v385_v41 = vadd.f32 %v384_v39, %v285_v22 }
  0xf2   : > { %v386_v43 = vpop.f32.mrf.mxu0 }
  0xf3   : > { %645 = vpow2.f32 %v616_v40  ;;  %v617_v44 = vmul.f32 -1.442695, %v385_v41  ;;  %v387_v45 = vadd.f32 %v386_v43, %v285_v22  ;;  %v528_v22 = vstv %s253_s11 }
  0xf4   : > { %647 = vpow2.f32 %v615_v38 }
  0xf5   : > { %649 = vpow2.f32 %v617_v44  ;;  %v618_v47 = vmul.f32 -1.442695, %v387_v45 }
  0xf6   : > { %651 = vpow2.f32 %v613_v42 }
  0xf7   : > { %653 = vpow2.f32 %v618_v47 }
  0xf8   : > { %655 = vpow2.f32 %v611_v46  ;;  %v642_v48 = vpop.eup %641 }
  0xf9   : > { %v414_v62 = vadd.f32 1.0, %v642_v48 }
  0xfc   : > { %v644_v49 = vpop.eup %643 }
  0xfd   : > { %v416_v59 = vadd.f32 1.0, %v644_v49 }
 0x100   : > { %v646_v50 = vpop.eup %645 }
 0x101   : > { %v648_v51 = vpop.eup %647  ;;  %v418_v52 = vadd.f32 1.0, %v646_v50 }
 0x102   : > { %v650_v53 = vpop.eup %649  ;;  %v417_v57 = vadd.f32 1.0, %v648_v51 }
 0x103   : > { %v652_v54 = vpop.eup %651  ;;  %v419_v55 = vadd.f32 1.0, %v650_v53  ;;  %657 = vrcp.f32 %v418_v52 }
 0x104   : > { %v654_v56 = vpop.eup %653  ;;  %v415_v61 = vadd.f32 1.0, %v652_v54 }
 0x105   : > { %v656_v58 = vpop.eup %655  ;;  %v420_v60 = vadd.f32 1.0, %v654_v56  ;;  %659 = vrcp.f32 %v419_v55 }
 0x106   : > { %v413_v63 = vadd.f32 1.0, %v656_v58 }
 0x107   : > { %661 = vrcp.f32 %v420_v60 }
 0x108   : > { %663 = vrcp.f32 %v417_v57 }
 0x109   : > { %665 = vrcp.f32 %v416_v59 }
 0x10a   : > { %667 = vrcp.f32 %v415_v61 }
 0x10b   : > { %669 = vrcp.f32 %v414_v62 }
 0x10c   : > { %671 = vrcp.f32 %v413_v63 }
 0x110   : > { %v658_v0 = vpop.eup %657 }
 0x111   : > { %v442_v10 = vmul.f32 %v658_v0, %v381_v36 }
 0x112   : > { %v660_v1 = vpop.eup %659 }
 0x113   : > { %v443_v8 = vmul.f32 %v660_v1, %v385_v41 }
 0x114   : > { %v662_v2 = vpop.eup %661 }
 0x115   : > { %v664_v3 = vpop.eup %663  ;;  %v444_v5 = vmul.f32 %v662_v2, %v387_v45 }
 0x116   : > { %v666_v7 = vpop.eup %665  ;;  %v441_v12 = vmul.f32 %v664_v3, %v379_v32 }
 0x117   : > { %v668_v9 = vpop.eup %667  ;;  %478 = vmatprep.subr.mxu1 %v444_v5  ;;  %v440_v14 = vmul.f32 %v666_v7, %v788_v29 }
 0x118   : > { %v670_v11 = vpop.eup %669  ;;  %479 = vmatpush1.msra.mxu1 %v443_v8  ;;  %v439_v15 = vmul.f32 %v668_v9, %v791_v33 }
 0x119   : > { %v672_v13 = vpop.eup %671  ;;  %480 = vmatprep.subr.mxu1 %v442_v10  ;;  %v438_v16 = vmul.f32 %v670_v11, %v786_v26  ;;  %v526_v26 = vmul.f32 %v525_v19, %v758_v6 }
 0x11a   : > { %481 = vmatpush1.msra.mxu1 %v441_v12  ;;  %v437_v17 = vmul.f32 %v672_v13, %v794_v37 }
 0x11b   : > { %482 = vmatprep.subr.mxu1 %v440_v14 }
 0x11c   : > { %483 = vmatpush1.msra.mxu1 %v439_v15 }
 0x11d   : > { %484 = vmatprep.subr.mxu1 %v438_v16 }
 0x11e   : > { %485 = vmatpush1.msra.mxu1 %v437_v17 }
 0x11f   : > { %619 = vmatmul.mubr.msk.f32.vlgmr.msra.gmra.mxu1 %vm450_vm2, %v236_v18 }
 0x1df   : > { %v520_v21 = vpop.f32.mrf.mxu1 }
 0x1e0   : > { %v521_v23 = vadd.f32 %v520_v21, %v448_v20 }
 0x1e1   : > { %v522_v24 = vpop.f32.mrf.mxu1 }
 0x1e2   : > { %v529_v27 = vmul.f32 %v528_v22, %v521_v23  ;;  %v523_v28 = vadd.f32 %v522_v24, %v448_v20 }
 0x1e4   : > { %v530_v29 = vmul.f32 %v528_v22, %v523_v28  ;;  %v531_v30 = vadd.f32 %v529_v27, %v526_v26 }
 0x1e6   : > { %v532_v31 = vadd.f32 %v530_v29, %v527_v25 }
 0x1e8   : > { %v535_v32 = vcombine.low %v531_v30, %v532_v31 }
 0x1ea   : > { %537 = vst [vmem:[%s231_s14] sm:$0xff] %v535_v32 }
 0x1eb PF: > { %s22_s26 = sadd.s32 1, %s693_s26  }
 0x1ec   : > { %p19_p9 = scmp.ge.s32.totalorder %s22_s26, 4  }
 0x1ee   :  { %21 = sbr.rel (!%p19_p9) target bundleno = 16 (0x10), region = 71 }

</bundles_post_ra>
